<compile_context>
chip_gen: v7x
topology: tpu7x:2x2x1
jax: 0.10.0
libtpu: 0.0.40
codegen_flags: <defaults>
</compile_context>

<pallas_src>
import functools
import math

import jax
import jax.numpy as jnp
from jax import lax
from jax.experimental import pallas as pl
from jax.experimental.pallas import tpu as pltpu


# ------------------------------ helpers ----------------------------------


def _unroll_for(trip):
    # Fully unroll short loops (LLO scheduler visibility); bounded unroll
    # at production trip counts so code size / live ranges stay bounded.
    return True if trip <= 16 else 8


# ------------------------------ kernels ---------------------------------


def _design_emb_kernel_edges(nodes_sm, edges_sm, children_sm, parents_sm,
                             emb_ref, pe_ref, out_ref,
                             emb_scr, pec_scr, pep_scr,
                             *, b_blk, seq_len, n_edges):
    """Grid (n_steps,).  out_ref is the (b_blk, total_len, dmodel) block of
    grid step g.  nodes_sm/edges_sm/children_sm/parents_sm are flattened 1-D
    SMEM scalar-prefetch refs; emb_ref (vocab, dmodel) and pe_ref
    (max_seq_len, dmodel) are VMEM-resident tables that are only addressed
    row-by-row.  emb_scr/pec_scr/pep_scr are f32 VMEM gather scratch.
    """
    g = pl.program_id(0)
    for bl in range(b_blk):                      # static, small
        bg = g * b_blk + bl                      # global batch index (scalar)
        emb_b = emb_scr.at[bl]
        pec_b = pec_scr.at[bl]
        pep_b = pep_scr.at[bl]
        out_b = out_ref.at[bl]

        # --- node gather: emb_table[nodes[bg, i]] -> emb_scr rows --------
        node_base = bg * seq_len

        def node_body(i, c):
            idx = nodes_sm[node_base + i]
            emb_b[pl.ds(i, 1), :] = emb_ref[pl.ds(idx, 1), :].astype(jnp.float32)
            return c

        lax.fori_loop(0, seq_len, node_body, 0, unroll=_unroll_for(seq_len))

        # --- edge gather: emb[edges], pe[children], pe[parents] ----------
        edge_base = bg * n_edges

        def edge_body(j, c):
            e = edges_sm[edge_base + j]
            ci = children_sm[edge_base + j]
            pi = parents_sm[edge_base + j]
            emb_b[pl.ds(seq_len + j, 1), :] = (
                emb_ref[pl.ds(e, 1), :].astype(jnp.float32))
            pec_b[pl.ds(j, 1), :] = pe_ref[pl.ds(ci, 1), :].astype(jnp.float32)
            pep_b[pl.ds(j, 1), :] = pe_ref[pl.ds(pi, 1), :].astype(jnp.float32)
            return c

        lax.fori_loop(0, n_edges, edge_body, 0, unroll=_unroll_for(n_edges))

        # --- vectorized epilogue: slab adds + dense stores ----------------
        out_b[0:seq_len, :] = (
            emb_b[0:seq_len, :] + pe_ref[0:seq_len, :].astype(jnp.float32)
        ).astype(out_ref.dtype)
        out_b[seq_len:seq_len + n_edges, :] = (
            emb_b[seq_len:seq_len + n_edges, :] + pec_b[...] + pep_b[...]
        ).astype(out_ref.dtype)


def _design_emb_kernel_nodes(nodes_sm, emb_ref, pe_ref, out_ref, emb_scr,
                             *, b_blk, seq_len):
    """No-edges branch (obs['edges'].shape[1] == 0)."""
    g = pl.program_id(0)
    for bl in range(b_blk):
        bg = g * b_blk + bl
        emb_b = emb_scr.at[bl]
        out_b = out_ref.at[bl]

        node_base = bg * seq_len

        def node_body(i, c):
            idx = nodes_sm[node_base + i]
            emb_b[pl.ds(i, 1), :] = emb_ref[pl.ds(idx, 1), :].astype(jnp.float32)
            return c

        lax.fori_loop(0, seq_len, node_body, 0, unroll=_unroll_for(seq_len))

        out_b[...] = (
            emb_b[...] + pe_ref[0:seq_len, :].astype(jnp.float32)
        ).astype(out_ref.dtype)


# ------------------------------ wrapper ----------------------------------


def design_embeddings_forward(obs, emb_table, pe):
    """Pallas implementation of DesignEmbeddings.forward."""
    nodes = obs["nodes"]
    edges = obs["edges"]

    bsz, seq_len = nodes.shape
    n_edges = edges.shape[1]
    vocab, dmodel = emb_table.shape
    max_seq_len = pe.shape[0]
    total_len = seq_len + n_edges

    # Batch blocking: exactly 2 balanced "parallel" grid steps when possible
    # (captures both v7x TensorCores; minimal per-step overhead on v5e/v6e),
    # a single big step otherwise.
    n_steps = 2 if (bsz >= 2 and bsz % 2 == 0) else 1
    b_blk = bsz // n_steps

    # Tables: full-array VMEM blocks with constant index_map (re-used every
    # grid step).  See header TODO for the production-size table plan.
    def table_spec(shape):
        return pl.BlockSpec(shape, lambda g, *_: (0, 0))

    out_spec = pl.BlockSpec((b_blk, total_len, dmodel),
                            lambda g, *_: (g, 0, 0))

    # Flattened 1-D int32 index arrays -> minimal SMEM padding.
    nodes_flat = nodes.reshape(-1).astype(jnp.int32)

    if n_edges > 0:   # static shape check, mirrors `if obs['edges'].shape[1] > 0`
        kernel = functools.partial(_design_emb_kernel_edges,
                                   b_blk=b_blk, seq_len=seq_len,
                                   n_edges=n_edges)
        num_prefetch = 4
        prefetch = (nodes_flat,
                    edges.reshape(-1).astype(jnp.int32),
                    obs["children"].reshape(-1).astype(jnp.int32),
                    obs["parents"].reshape(-1).astype(jnp.int32))
        scratch = [pltpu.VMEM((b_blk, total_len, dmodel), jnp.float32),
                   pltpu.VMEM((b_blk, n_edges, dmodel), jnp.float32),
                   pltpu.VMEM((b_blk, n_edges, dmodel), jnp.float32)]
    else:
        kernel = functools.partial(_design_emb_kernel_nodes,
                                   b_blk=b_blk, seq_len=seq_len)
        num_prefetch = 1
        prefetch = (nodes_flat,)
        scratch = [pltpu.VMEM((b_blk, seq_len, dmodel), jnp.float32)]

    grid_spec = pltpu.PrefetchScalarGridSpec(
        num_scalar_prefetch=num_prefetch,
        grid=(n_steps,),
        in_specs=[table_spec((vocab, dmodel)),
                  table_spec((max_seq_len, dmodel))],
        out_specs=out_spec,
        scratch_shapes=scratch,
    )

    return pl.pallas_call(
        kernel,
        out_shape=jax.ShapeDtypeStruct((bsz, total_len, dmodel),
                                       emb_table.dtype),
        grid_spec=grid_spec,
        compiler_params=pltpu.CompilerParams(
            dimension_semantics=("parallel",)),   # 2x on v7x (2 TCs/chip)
    )(*prefetch, emb_table, pe)


# ----------------------- parameter / buffer construction -----------------


def make_sinusoidal_pe(max_seq_len, dmodel):
    position = jnp.arange(max_seq_len, dtype=jnp.float32)[:, None]
    div_term = jnp.exp(jnp.arange(0, dmodel, 2, dtype=jnp.float32)
                       * (-math.log(10000.0) / dmodel))
    pe = jnp.zeros((max_seq_len, dmodel), dtype=jnp.float32)
    pe = pe.at[:, 0::2].set(jnp.sin(position * div_term))
    pe = pe.at[:, 1::2].set(jnp.cos(position * div_term))
    return pe


# --------------------------- pure-JAX reference --------------------------


def design_embeddings_reference(obs, emb_table, pe):
    nodes, edges = obs["nodes"], obs["edges"]
    bsz, seq_len = nodes.shape
    pe_nodes = jnp.broadcast_to(pe[:seq_len][None, :, :],
                                (bsz, seq_len, pe.shape[1]))
    emb = emb_table[nodes]
    if edges.shape[1] > 0:
        edge_pe = pe[obs["children"]] + pe[obs["parents"]]
        pe_all = jnp.concatenate([pe_nodes, edge_pe], axis=1)
        emb = jnp.concatenate([emb, emb_table[edges]], axis=1)
    else:
        pe_all = pe_nodes
    return (emb + pe_all).astype(emb_table.dtype)


# --------------------------------- main ----------------------------------


def _make_obs(key, bsz, seq_len, n_edges, nsymbols):
    k_nodes, k_edges, k_ch, k_pa = jax.random.split(key, 4)
    return {
        "nodes": jax.random.randint(k_nodes, (bsz, seq_len), 0, nsymbols + 1,
                                    dtype=jnp.int32),
        "edges": jax.random.randint(k_edges, (bsz, n_edges), 0, nsymbols + 1,
                                    dtype=jnp.int32),
        "children": jax.random.randint(k_ch, (bsz, n_edges), 1, seq_len,
                                       dtype=jnp.int32),
        "parents": jax.random.randint(k_pa, (bsz, n_edges), 0, seq_len,
                                      dtype=jnp.int32),
    }


if __name__ == "__main__":
    dmodel = 32
    nsymbols = 10
    max_seq_len = 100
    seq_len, n_edges = 8, 4

    key = jax.random.PRNGKey(0)
    k_emb, k_obs, k_obs4 = jax.random.split(key, 3)

    # nn.Embedding(nsymbols + 1, dmodel) default init: N(0, 1)
    emb_table = jax.random.normal(k_emb, (nsymbols + 1, dmodel),
                                  dtype=jnp.float32)
    pe = make_sinusoidal_pe(max_seq_len, dmodel)

    # --- bsz=2 (b_blk=1, two parallel grid steps), edge branch -----------
    obs = _make_obs(k_obs, 2, seq_len, n_edges, nsymbols)
    out = jax.block_until_ready(design_embeddings_forward(obs, emb_table, pe))
    ref = design_embeddings_reference(obs, emb_table, pe)
    assert out.shape == (2, seq_len + n_edges, dmodel)
    assert jnp.allclose(out, ref, atol=1e-5, rtol=1e-5), "edge branch mismatch"

    # --- bsz=4 (b_blk=2 per grid step), edge branch -----------------------
    obs4 = _make_obs(k_obs4, 4, seq_len, n_edges, nsymbols)
    out4 = jax.block_until_ready(design_embeddings_forward(obs4, emb_table, pe))
    ref4 = design_embeddings_reference(obs4, emb_table, pe)
    assert out4.shape == (4, seq_len + n_edges, dmodel)
    assert jnp.allclose(out4, ref4, atol=1e-5, rtol=1e-5), "blocked batch mismatch"

    # --- no-edge branch (obs['edges'].shape[1] == 0) ----------------------
    obs_no_edges = dict(obs,
                        edges=jnp.zeros((2, 0), jnp.int32),
                        children=jnp.zeros((2, 0), jnp.int32),
                        parents=jnp.zeros((2, 0), jnp.int32))
    out2 = jax.block_until_ready(
        design_embeddings_forward(obs_no_edges, emb_table, pe))
    ref2 = design_embeddings_reference(obs_no_edges, emb_table, pe)
    assert out2.shape == (2, seq_len, dmodel)
    assert jnp.allclose(out2, ref2, atol=1e-5, rtol=1e-5), "node branch mismatch"

    print("KERNEL_OK")
</pallas_src>

<mosaic_0001>
module attributes {stable_mosaic.version = 11 : i64} {
  func.func @_design_emb_kernel_edges(%arg0: i32, %arg1: memref<16xi32, #tpu.memory_space<smem>>, %arg2: memref<8xi32, #tpu.memory_space<smem>>, %arg3: memref<8xi32, #tpu.memory_space<smem>>, %arg4: memref<8xi32, #tpu.memory_space<smem>>, %arg5: memref<11x32xf32, #tpu.memory_space<vmem>>, %arg6: memref<100x32xf32, #tpu.memory_space<vmem>>, %arg7: memref<1x12x32xf32, #tpu.memory_space<vmem>>, %arg8: memref<1x12x32xf32, #tpu.memory_space<vmem>>, %arg9: memref<1x4x32xf32, #tpu.memory_space<vmem>>, %arg10: memref<1x4x32xf32, #tpu.memory_space<vmem>>) attributes {dimension_semantics = [#tpu.dimension_semantics<parallel>], iteration_bounds = array<i64: 2>, scalar_prefetch = 4 : i64, scratch_operands = 3 : i64, tpu.core_type = #tpu.core_type<tc>, window_params = [{pipeline_mode = #tpu.pipeline_mode<synchronous>, transform_indices = @transform_0, window_bounds = array<i64: 11, 32>}, {pipeline_mode = #tpu.pipeline_mode<synchronous>, transform_indices = @transform_1, window_bounds = array<i64: 100, 32>}, {transform_indices = @transform_2, window_bounds = array<i64: 1, 12, 32>}]} {
    %c1_i32 = arith.constant 1 : i32
    %0 = arith.muli %arg0, %c1_i32 : i32
    %c0_i32 = arith.constant 0 : i32
    %1 = arith.addi %0, %c0_i32 : i32
    %c8_i32 = arith.constant 8 : i32
    %2 = arith.muli %1, %c8_i32 : i32
    %c0_i32_0 = arith.constant 0 : i32
    %c0_i32_1 = arith.constant 0 : i32
    %3 = arith.addi %2, %c0_i32_1 : i32
    %4 = arith.index_cast %3 : i32 to index
    %5 = memref.load %arg1[%4] : memref<16xi32, #tpu.memory_space<smem>>
    %6 = arith.index_cast %5 : i32 to index
    %c0 = arith.constant 0 : index
    %7 = vector.load %arg5[%6, %c0] : memref<11x32xf32, #tpu.memory_space<vmem>>, vector<1x32xf32>
    %c0_i32_2 = arith.constant 0 : i32
    %c0_i32_3 = arith.constant 0 : i32
    %8 = tpu.memref_slice %arg8[%c0_i32_0, %c0_i32_2, %c0_i32_3] : memref<1x12x32xf32, #tpu.memory_space<vmem>> -> memref<1x12x32xf32, #tpu.memory_space<vmem>>
    %9 = tpu.memref_squeeze %8 : memref<1x12x32xf32, #tpu.memory_space<vmem>> -> memref<12x32xf32, #tpu.memory_space<vmem>>
    %10 = arith.index_cast %c0_i32_1 : i32 to index
    %c0_4 = arith.constant 0 : index
    %11 = vector.load %9[%10, %c0_4] : memref<12x32xf32, #tpu.memory_space<vmem>>, vector<1x32xf32>
    tpu.vector_store %9[%10, %c0_4], %7 {strides = array<i32>} : memref<12x32xf32, #tpu.memory_space<vmem>>, vector<1x32xf32>,
    %c1_i32_5 = arith.constant 1 : i32
    %12 = arith.addi %2, %c1_i32_5 : i32
    %13 = arith.index_cast %12 : i32 to index
    %14 = memref.load %arg1[%13] : memref<16xi32, #tpu.memory_space<smem>>
    %15 = arith.index_cast %14 : i32 to index
    %c0_6 = arith.constant 0 : index
    %16 = vector.load %arg5[%15, %c0_6] : memref<11x32xf32, #tpu.memory_space<vmem>>, vector<1x32xf32>
    %c0_i32_7 = arith.constant 0 : i32
    %c0_i32_8 = arith.constant 0 : i32
    %17 = tpu.memref_slice %arg8[%c0_i32_0, %c0_i32_7, %c0_i32_8] : memref<1x12x32xf32, #tpu.memory_space<vmem>> -> memref<1x12x32xf32, #tpu.memory_space<vmem>>
    %18 = tpu.memref_squeeze %17 : memref<1x12x32xf32, #tpu.memory_space<vmem>> -> memref<12x32xf32, #tpu.memory_space<vmem>>
    %19 = arith.index_cast %c1_i32_5 : i32 to index
    %c0_9 = arith.constant 0 : index
    %20 = vector.load %18[%19, %c0_9] : memref<12x32xf32, #tpu.memory_space<vmem>>, vector<1x32xf32>
    tpu.vector_store %18[%19, %c0_9], %16 {strides = array<i32>} : memref<12x32xf32, #tpu.memory_space<vmem>>, vector<1x32xf32>,
    %c2_i32 = arith.constant 2 : i32
    %21 = arith.addi %2, %c2_i32 : i32
    %22 = arith.index_cast %21 : i32 to index
    %23 = memref.load %arg1[%22] : memref<16xi32, #tpu.memory_space<smem>>
    %24 = arith.index_cast %23 : i32 to index
    %c0_10 = arith.constant 0 : index
    %25 = vector.load %arg5[%24, %c0_10] : memref<11x32xf32, #tpu.memory_space<vmem>>, vector<1x32xf32>
    %c0_i32_11 = arith.constant 0 : i32
    %c0_i32_12 = arith.constant 0 : i32
    %26 = tpu.memref_slice %arg8[%c0_i32_0, %c0_i32_11, %c0_i32_12] : memref<1x12x32xf32, #tpu.memory_space<vmem>> -> memref<1x12x32xf32, #tpu.memory_space<vmem>>
    %27 = tpu.memref_squeeze %26 : memref<1x12x32xf32, #tpu.memory_space<vmem>> -> memref<12x32xf32, #tpu.memory_space<vmem>>
    %28 = arith.index_cast %c2_i32 : i32 to index
    %c0_13 = arith.constant 0 : index
    %29 = vector.load %27[%28, %c0_13] : memref<12x32xf32, #tpu.memory_space<vmem>>, vector<1x32xf32>
    tpu.vector_store %27[%28, %c0_13], %25 {strides = array<i32>} : memref<12x32xf32, #tpu.memory_space<vmem>>, vector<1x32xf32>,
    %c3_i32 = arith.constant 3 : i32
    %30 = arith.addi %2, %c3_i32 : i32
    %31 = arith.index_cast %30 : i32 to index
    %32 = memref.load %arg1[%31] : memref<16xi32, #tpu.memory_space<smem>>
    %33 = arith.index_cast %32 : i32 to index
    %c0_14 = arith.constant 0 : index
    %34 = vector.load %arg5[%33, %c0_14] : memref<11x32xf32, #tpu.memory_space<vmem>>, vector<1x32xf32>
    %c0_i32_15 = arith.constant 0 : i32
    %c0_i32_16 = arith.constant 0 : i32
    %35 = tpu.memref_slice %arg8[%c0_i32_0, %c0_i32_15, %c0_i32_16] : memref<1x12x32xf32, #tpu.memory_space<vmem>> -> memref<1x12x32xf32, #tpu.memory_space<vmem>>
    %36 = tpu.memref_squeeze %35 : memref<1x12x32xf32, #tpu.memory_space<vmem>> -> memref<12x32xf32, #tpu.memory_space<vmem>>
    %37 = arith.index_cast %c3_i32 : i32 to index
    %c0_17 = arith.constant 0 : index
    %38 = vector.load %36[%37, %c0_17] : memref<12x32xf32, #tpu.memory_space<vmem>>, vector<1x32xf32>
    tpu.vector_store %36[%37, %c0_17], %34 {strides = array<i32>} : memref<12x32xf32, #tpu.memory_space<vmem>>, vector<1x32xf32>,
    %c4_i32 = arith.constant 4 : i32
    %39 = arith.addi %2, %c4_i32 : i32
    %40 = arith.index_cast %39 : i32 to index
    %41 = memref.load %arg1[%40] : memref<16xi32, #tpu.memory_space<smem>>
    %42 = arith.index_cast %41 : i32 to index
    %c0_18 = arith.constant 0 : index
    %43 = vector.load %arg5[%42, %c0_18] : memref<11x32xf32, #tpu.memory_space<vmem>>, vector<1x32xf32>
    %c0_i32_19 = arith.constant 0 : i32
    %c0_i32_20 = arith.constant 0 : i32
    %44 = tpu.memref_slice %arg8[%c0_i32_0, %c0_i32_19, %c0_i32_20] : memref<1x12x32xf32, #tpu.memory_space<vmem>> -> memref<1x12x32xf32, #tpu.memory_space<vmem>>
    %45 = tpu.memref_squeeze %44 : memref<1x12x32xf32, #tpu.memory_space<vmem>> -> memref<12x32xf32, #tpu.memory_space<vmem>>
    %46 = arith.index_cast %c4_i32 : i32 to index
    %c0_21 = arith.constant 0 : index
    %47 = vector.load %45[%46, %c0_21] : memref<12x32xf32, #tpu.memory_space<vmem>>, vector<1x32xf32>
    tpu.vector_store %45[%46, %c0_21], %43 {strides = array<i32>} : memref<12x32xf32, #tpu.memory_space<vmem>>, vector<1x32xf32>,
    %c5_i32 = arith.constant 5 : i32
    %48 = arith.addi %2, %c5_i32 : i32
    %49 = arith.index_cast %48 : i32 to index
    %50 = memref.load %arg1[%49] : memref<16xi32, #tpu.memory_space<smem>>
    %51 = arith.index_cast %50 : i32 to index
    %c0_22 = arith.constant 0 : index
    %52 = vector.load %arg5[%51, %c0_22] : memref<11x32xf32, #tpu.memory_space<vmem>>, vector<1x32xf32>
    %c0_i32_23 = arith.constant 0 : i32
    %c0_i32_24 = arith.constant 0 : i32
    %53 = tpu.memref_slice %arg8[%c0_i32_0, %c0_i32_23, %c0_i32_24] : memref<1x12x32xf32, #tpu.memory_space<vmem>> -> memref<1x12x32xf32, #tpu.memory_space<vmem>>
    %54 = tpu.memref_squeeze %53 : memref<1x12x32xf32, #tpu.memory_space<vmem>> -> memref<12x32xf32, #tpu.memory_space<vmem>>
    %55 = arith.index_cast %c5_i32 : i32 to index
    %c0_25 = arith.constant 0 : index
    %56 = vector.load %54[%55, %c0_25] : memref<12x32xf32, #tpu.memory_space<vmem>>, vector<1x32xf32>
    tpu.vector_store %54[%55, %c0_25], %52 {strides = array<i32>} : memref<12x32xf32, #tpu.memory_space<vmem>>, vector<1x32xf32>,
    %c6_i32 = arith.constant 6 : i32
    %57 = arith.addi %2, %c6_i32 : i32
    %58 = arith.index_cast %57 : i32 to index
    %59 = memref.load %arg1[%58] : memref<16xi32, #tpu.memory_space<smem>>
    %60 = arith.index_cast %59 : i32 to index
    %c0_26 = arith.constant 0 : index
    %61 = vector.load %arg5[%60, %c0_26] : memref<11x32xf32, #tpu.memory_space<vmem>>, vector<1x32xf32>
    %c0_i32_27 = arith.constant 0 : i32
    %c0_i32_28 = arith.constant 0 : i32
    %62 = tpu.memref_slice %arg8[%c0_i32_0, %c0_i32_27, %c0_i32_28] : memref<1x12x32xf32, #tpu.memory_space<vmem>> -> memref<1x12x32xf32, #tpu.memory_space<vmem>>
    %63 = tpu.memref_squeeze %62 : memref<1x12x32xf32, #tpu.memory_space<vmem>> -> memref<12x32xf32, #tpu.memory_space<vmem>>
    %64 = arith.index_cast %c6_i32 : i32 to index
    %c0_29 = arith.constant 0 : index
    %65 = vector.load %63[%64, %c0_29] : memref<12x32xf32, #tpu.memory_space<vmem>>, vector<1x32xf32>
    tpu.vector_store %63[%64, %c0_29], %61 {strides = array<i32>} : memref<12x32xf32, #tpu.memory_space<vmem>>, vector<1x32xf32>,
    %c7_i32 = arith.constant 7 : i32
    %66 = arith.addi %2, %c7_i32 : i32
    %67 = arith.index_cast %66 : i32 to index
    %68 = memref.load %arg1[%67] : memref<16xi32, #tpu.memory_space<smem>>
    %69 = arith.index_cast %68 : i32 to index
    %c0_30 = arith.constant 0 : index
    %70 = vector.load %arg5[%69, %c0_30] : memref<11x32xf32, #tpu.memory_space<vmem>>, vector<1x32xf32>
    %c0_i32_31 = arith.constant 0 : i32
    %c0_i32_32 = arith.constant 0 : i32
    %71 = tpu.memref_slice %arg8[%c0_i32_0, %c0_i32_31, %c0_i32_32] : memref<1x12x32xf32, #tpu.memory_space<vmem>> -> memref<1x12x32xf32, #tpu.memory_space<vmem>>
    %72 = tpu.memref_squeeze %71 : memref<1x12x32xf32, #tpu.memory_space<vmem>> -> memref<12x32xf32, #tpu.memory_space<vmem>>
    %73 = arith.index_cast %c7_i32 : i32 to index
    %c0_33 = arith.constant 0 : index
    %74 = vector.load %72[%73, %c0_33] : memref<12x32xf32, #tpu.memory_space<vmem>>, vector<1x32xf32>
    tpu.vector_store %72[%73, %c0_33], %70 {strides = array<i32>} : memref<12x32xf32, #tpu.memory_space<vmem>>, vector<1x32xf32>,
    %c8_i32_34 = arith.constant 8 : i32
    %c4_i32_35 = arith.constant 4 : i32
    %75 = arith.muli %1, %c4_i32_35 : i32
    %c0_i32_36 = arith.constant 0 : i32
    %c0_i32_37 = arith.constant 0 : i32
    %c0_i32_38 = arith.constant 0 : i32
    %c0_i32_39 = arith.constant 0 : i32
    %76 = arith.addi %75, %c0_i32_39 : i32
    %77 = arith.index_cast %76 : i32 to index
    %78 = memref.load %arg2[%77] : memref<8xi32, #tpu.memory_space<smem>>
    %79 = arith.addi %75, %c0_i32_39 : i32
    %80 = arith.index_cast %79 : i32 to index
    %81 = memref.load %arg3[%80] : memref<8xi32, #tpu.memory_space<smem>>
    %82 = arith.addi %75, %c0_i32_39 : i32
    %83 = arith.index_cast %82 : i32 to index
    %84 = memref.load %arg4[%83] : memref<8xi32, #tpu.memory_space<smem>>
    %85 = arith.index_cast %78 : i32 to index
    %c0_40 = arith.constant 0 : index
    %86 = vector.load %arg5[%85, %c0_40] : memref<11x32xf32, #tpu.memory_space<vmem>>, vector<1x32xf32>
    %c8_i32_41 = arith.constant 8 : i32
    %87 = arith.addi %c8_i32_41, %c0_i32_39 : i32
    %c0_i32_42 = arith.constant 0 : i32
    %c0_i32_43 = arith.constant 0 : i32
    %88 = tpu.memref_slice %arg8[%c0_i32_36, %c0_i32_42, %c0_i32_43] : memref<1x12x32xf32, #tpu.memory_space<vmem>> -> memref<1x12x32xf32, #tpu.memory_space<vmem>>
    %89 = tpu.memref_squeeze %88 : memref<1x12x32xf32, #tpu.memory_space<vmem>> -> memref<12x32xf32, #tpu.memory_space<vmem>>
    %90 = arith.index_cast %87 : i32 to index
    %c0_44 = arith.constant 0 : index
    %91 = vector.load %89[%90, %c0_44] : memref<12x32xf32, #tpu.memory_space<vmem>>, vector<1x32xf32>
    tpu.vector_store %89[%90, %c0_44], %86 {strides = array<i32>} : memref<12x32xf32, #tpu.memory_space<vmem>>, vector<1x32xf32>,
    %92 = arith.index_cast %81 : i32 to index
    %c0_45 = arith.constant 0 : index
    %93 = vector.load %arg6[%92, %c0_45] : memref<100x32xf32, #tpu.memory_space<vmem>>, vector<1x32xf32>
    %c0_i32_46 = arith.constant 0 : i32
    %c0_i32_47 = arith.constant 0 : i32
    %94 = tpu.memref_slice %arg9[%c0_i32_37, %c0_i32_46, %c0_i32_47] : memref<1x4x32xf32, #tpu.memory_space<vmem>> -> memref<1x4x32xf32, #tpu.memory_space<vmem>>
    %95 = tpu.memref_squeeze %94 : memref<1x4x32xf32, #tpu.memory_space<vmem>> -> memref<4x32xf32, #tpu.memory_space<vmem>>
    %96 = arith.index_cast %c0_i32_39 : i32 to index
    %c0_48 = arith.constant 0 : index
    %97 = vector.load %95[%96, %c0_48] : memref<4x32xf32, #tpu.memory_space<vmem>>, vector<1x32xf32>
    tpu.vector_store %95[%96, %c0_48], %93 {strides = array<i32>} : memref<4x32xf32, #tpu.memory_space<vmem>>, vector<1x32xf32>,
    %98 = arith.index_cast %84 : i32 to index
    %c0_49 = arith.constant 0 : index
    %99 = vector.load %arg6[%98, %c0_49] : memref<100x32xf32, #tpu.memory_space<vmem>>, vector<1x32xf32>
    %c0_i32_50 = arith.constant 0 : i32
    %c0_i32_51 = arith.constant 0 : i32
    %100 = tpu.memref_slice %arg10[%c0_i32_38, %c0_i32_50, %c0_i32_51] : memref<1x4x32xf32, #tpu.memory_space<vmem>> -> memref<1x4x32xf32, #tpu.memory_space<vmem>>
    %101 = tpu.memref_squeeze %100 : memref<1x4x32xf32, #tpu.memory_space<vmem>> -> memref<4x32xf32, #tpu.memory_space<vmem>>
    %102 = arith.index_cast %c0_i32_39 : i32 to index
    %c0_52 = arith.constant 0 : index
    %103 = vector.load %101[%102, %c0_52] : memref<4x32xf32, #tpu.memory_space<vmem>>, vector<1x32xf32>
    tpu.vector_store %101[%102, %c0_52], %99 {strides = array<i32>} : memref<4x32xf32, #tpu.memory_space<vmem>>, vector<1x32xf32>,
    %c1_i32_53 = arith.constant 1 : i32
    %104 = arith.addi %75, %c1_i32_53 : i32
    %105 = arith.index_cast %104 : i32 to index
    %106 = memref.load %arg2[%105] : memref<8xi32, #tpu.memory_space<smem>>
    %107 = arith.addi %75, %c1_i32_53 : i32
    %108 = arith.index_cast %107 : i32 to index
    %109 = memref.load %arg3[%108] : memref<8xi32, #tpu.memory_space<smem>>
    %110 = arith.addi %75, %c1_i32_53 : i32
    %111 = arith.index_cast %110 : i32 to index
    %112 = memref.load %arg4[%111] : memref<8xi32, #tpu.memory_space<smem>>
    %113 = arith.index_cast %106 : i32 to index
    %c0_54 = arith.constant 0 : index
    %114 = vector.load %arg5[%113, %c0_54] : memref<11x32xf32, #tpu.memory_space<vmem>>, vector<1x32xf32>
    %c8_i32_55 = arith.constant 8 : i32
    %115 = arith.addi %c8_i32_55, %c1_i32_53 : i32
    %c0_i32_56 = arith.constant 0 : i32
    %c0_i32_57 = arith.constant 0 : i32
    %116 = tpu.memref_slice %arg8[%c0_i32_36, %c0_i32_56, %c0_i32_57] : memref<1x12x32xf32, #tpu.memory_space<vmem>> -> memref<1x12x32xf32, #tpu.memory_space<vmem>>
    %117 = tpu.memref_squeeze %116 : memref<1x12x32xf32, #tpu.memory_space<vmem>> -> memref<12x32xf32, #tpu.memory_space<vmem>>
    %118 = arith.index_cast %115 : i32 to index
    %c0_58 = arith.constant 0 : index
    %119 = vector.load %117[%118, %c0_58] : memref<12x32xf32, #tpu.memory_space<vmem>>, vector<1x32xf32>
    tpu.vector_store %117[%118, %c0_58], %114 {strides = array<i32>} : memref<12x32xf32, #tpu.memory_space<vmem>>, vector<1x32xf32>,
    %120 = arith.index_cast %109 : i32 to index
    %c0_59 = arith.constant 0 : index
    %121 = vector.load %arg6[%120, %c0_59] : memref<100x32xf32, #tpu.memory_space<vmem>>, vector<1x32xf32>
    %c0_i32_60 = arith.constant 0 : i32
    %c0_i32_61 = arith.constant 0 : i32
    %122 = tpu.memref_slice %arg9[%c0_i32_37, %c0_i32_60, %c0_i32_61] : memref<1x4x32xf32, #tpu.memory_space<vmem>> -> memref<1x4x32xf32, #tpu.memory_space<vmem>>
    %123 = tpu.memref_squeeze %122 : memref<1x4x32xf32, #tpu.memory_space<vmem>> -> memref<4x32xf32, #tpu.memory_space<vmem>>
    %124 = arith.index_cast %c1_i32_53 : i32 to index
    %c0_62 = arith.constant 0 : index
    %125 = vector.load %123[%124, %c0_62] : memref<4x32xf32, #tpu.memory_space<vmem>>, vector<1x32xf32>
    tpu.vector_store %123[%124, %c0_62], %121 {strides = array<i32>} : memref<4x32xf32, #tpu.memory_space<vmem>>, vector<1x32xf32>,
    %126 = arith.index_cast %112 : i32 to index
    %c0_63 = arith.constant 0 : index
    %127 = vector.load %arg6[%126, %c0_63] : memref<100x32xf32, #tpu.memory_space<vmem>>, vector<1x32xf32>
    %c0_i32_64 = arith.constant 0 : i32
    %c0_i32_65 = arith.constant 0 : i32
    %128 = tpu.memref_slice %arg10[%c0_i32_38, %c0_i32_64, %c0_i32_65] : memref<1x4x32xf32, #tpu.memory_space<vmem>> -> memref<1x4x32xf32, #tpu.memory_space<vmem>>
    %129 = tpu.memref_squeeze %128 : memref<1x4x32xf32, #tpu.memory_space<vmem>> -> memref<4x32xf32, #tpu.memory_space<vmem>>
    %130 = arith.index_cast %c1_i32_53 : i32 to index
    %c0_66 = arith.constant 0 : index
    %131 = vector.load %129[%130, %c0_66] : memref<4x32xf32, #tpu.memory_space<vmem>>, vector<1x32xf32>
    tpu.vector_store %129[%130, %c0_66], %127 {strides = array<i32>} : memref<4x32xf32, #tpu.memory_space<vmem>>, vector<1x32xf32>,
    %c2_i32_67 = arith.constant 2 : i32
    %132 = arith.addi %75, %c2_i32_67 : i32
    %133 = arith.index_cast %132 : i32 to index
    %134 = memref.load %arg2[%133] : memref<8xi32, #tpu.memory_space<smem>>
    %135 = arith.addi %75, %c2_i32_67 : i32
    %136 = arith.index_cast %135 : i32 to index
    %137 = memref.load %arg3[%136] : memref<8xi32, #tpu.memory_space<smem>>
    %138 = arith.addi %75, %c2_i32_67 : i32
    %139 = arith.index_cast %138 : i32 to index
    %140 = memref.load %arg4[%139] : memref<8xi32, #tpu.memory_space<smem>>
    %141 = arith.index_cast %134 : i32 to index
    %c0_68 = arith.constant 0 : index
    %142 = vector.load %arg5[%141, %c0_68] : memref<11x32xf32, #tpu.memory_space<vmem>>, vector<1x32xf32>
    %c8_i32_69 = arith.constant 8 : i32
    %143 = arith.addi %c8_i32_69, %c2_i32_67 : i32
    %c0_i32_70 = arith.constant 0 : i32
    %c0_i32_71 = arith.constant 0 : i32
    %144 = tpu.memref_slice %arg8[%c0_i32_36, %c0_i32_70, %c0_i32_71] : memref<1x12x32xf32, #tpu.memory_space<vmem>> -> memref<1x12x32xf32, #tpu.memory_space<vmem>>
    %145 = tpu.memref_squeeze %144 : memref<1x12x32xf32, #tpu.memory_space<vmem>> -> memref<12x32xf32, #tpu.memory_space<vmem>>
    %146 = arith.index_cast %143 : i32 to index
    %c0_72 = arith.constant 0 : index
    %147 = vector.load %145[%146, %c0_72] : memref<12x32xf32, #tpu.memory_space<vmem>>, vector<1x32xf32>
    tpu.vector_store %145[%146, %c0_72], %142 {strides = array<i32>} : memref<12x32xf32, #tpu.memory_space<vmem>>, vector<1x32xf32>,
    %148 = arith.index_cast %137 : i32 to index
    %c0_73 = arith.constant 0 : index
    %149 = vector.load %arg6[%148, %c0_73] : memref<100x32xf32, #tpu.memory_space<vmem>>, vector<1x32xf32>
    %c0_i32_74 = arith.constant 0 : i32
    %c0_i32_75 = arith.constant 0 : i32
    %150 = tpu.memref_slice %arg9[%c0_i32_37, %c0_i32_74, %c0_i32_75] : memref<1x4x32xf32, #tpu.memory_space<vmem>> -> memref<1x4x32xf32, #tpu.memory_space<vmem>>
    %151 = tpu.memref_squeeze %150 : memref<1x4x32xf32, #tpu.memory_space<vmem>> -> memref<4x32xf32, #tpu.memory_space<vmem>>
    %152 = arith.index_cast %c2_i32_67 : i32 to index
    %c0_76 = arith.constant 0 : index
    %153 = vector.load %151[%152, %c0_76] : memref<4x32xf32, #tpu.memory_space<vmem>>, vector<1x32xf32>
    tpu.vector_store %151[%152, %c0_76], %149 {strides = array<i32>} : memref<4x32xf32, #tpu.memory_space<vmem>>, vector<1x32xf32>,
    %154 = arith.index_cast %140 : i32 to index
    %c0_77 = arith.constant 0 : index
    %155 = vector.load %arg6[%154, %c0_77] : memref<100x32xf32, #tpu.memory_space<vmem>>, vector<1x32xf32>
    %c0_i32_78 = arith.constant 0 : i32
    %c0_i32_79 = arith.constant 0 : i32
    %156 = tpu.memref_slice %arg10[%c0_i32_38, %c0_i32_78, %c0_i32_79] : memref<1x4x32xf32, #tpu.memory_space<vmem>> -> memref<1x4x32xf32, #tpu.memory_space<vmem>>
    %157 = tpu.memref_squeeze %156 : memref<1x4x32xf32, #tpu.memory_space<vmem>> -> memref<4x32xf32, #tpu.memory_space<vmem>>
    %158 = arith.index_cast %c2_i32_67 : i32 to index
    %c0_80 = arith.constant 0 : index
    %159 = vector.load %157[%158, %c0_80] : memref<4x32xf32, #tpu.memory_space<vmem>>, vector<1x32xf32>
    tpu.vector_store %157[%158, %c0_80], %155 {strides = array<i32>} : memref<4x32xf32, #tpu.memory_space<vmem>>, vector<1x32xf32>,
    %c3_i32_81 = arith.constant 3 : i32
    %160 = arith.addi %75, %c3_i32_81 : i32
    %161 = arith.index_cast %160 : i32 to index
    %162 = memref.load %arg2[%161] : memref<8xi32, #tpu.memory_space<smem>>
    %163 = arith.addi %75, %c3_i32_81 : i32
    %164 = arith.index_cast %163 : i32 to index
    %165 = memref.load %arg3[%164] : memref<8xi32, #tpu.memory_space<smem>>
    %166 = arith.addi %75, %c3_i32_81 : i32
    %167 = arith.index_cast %166 : i32 to index
    %168 = memref.load %arg4[%167] : memref<8xi32, #tpu.memory_space<smem>>
    %169 = arith.index_cast %162 : i32 to index
    %c0_82 = arith.constant 0 : index
    %170 = vector.load %arg5[%169, %c0_82] : memref<11x32xf32, #tpu.memory_space<vmem>>, vector<1x32xf32>
    %c8_i32_83 = arith.constant 8 : i32
    %171 = arith.addi %c8_i32_83, %c3_i32_81 : i32
    %c0_i32_84 = arith.constant 0 : i32
    %c0_i32_85 = arith.constant 0 : i32
    %172 = tpu.memref_slice %arg8[%c0_i32_36, %c0_i32_84, %c0_i32_85] : memref<1x12x32xf32, #tpu.memory_space<vmem>> -> memref<1x12x32xf32, #tpu.memory_space<vmem>>
    %173 = tpu.memref_squeeze %172 : memref<1x12x32xf32, #tpu.memory_space<vmem>> -> memref<12x32xf32, #tpu.memory_space<vmem>>
    %174 = arith.index_cast %171 : i32 to index
    %c0_86 = arith.constant 0 : index
    %175 = vector.load %173[%174, %c0_86] : memref<12x32xf32, #tpu.memory_space<vmem>>, vector<1x32xf32>
    tpu.vector_store %173[%174, %c0_86], %170 {strides = array<i32>} : memref<12x32xf32, #tpu.memory_space<vmem>>, vector<1x32xf32>,
    %176 = arith.index_cast %165 : i32 to index
    %c0_87 = arith.constant 0 : index
    %177 = vector.load %arg6[%176, %c0_87] : memref<100x32xf32, #tpu.memory_space<vmem>>, vector<1x32xf32>
    %c0_i32_88 = arith.constant 0 : i32
    %c0_i32_89 = arith.constant 0 : i32
    %178 = tpu.memref_slice %arg9[%c0_i32_37, %c0_i32_88, %c0_i32_89] : memref<1x4x32xf32, #tpu.memory_space<vmem>> -> memref<1x4x32xf32, #tpu.memory_space<vmem>>
    %179 = tpu.memref_squeeze %178 : memref<1x4x32xf32, #tpu.memory_space<vmem>> -> memref<4x32xf32, #tpu.memory_space<vmem>>
    %180 = arith.index_cast %c3_i32_81 : i32 to index
    %c0_90 = arith.constant 0 : index
    %181 = vector.load %179[%180, %c0_90] : memref<4x32xf32, #tpu.memory_space<vmem>>, vector<1x32xf32>
    tpu.vector_store %179[%180, %c0_90], %177 {strides = array<i32>} : memref<4x32xf32, #tpu.memory_space<vmem>>, vector<1x32xf32>,
    %182 = arith.index_cast %168 : i32 to index
    %c0_91 = arith.constant 0 : index
    %183 = vector.load %arg6[%182, %c0_91] : memref<100x32xf32, #tpu.memory_space<vmem>>, vector<1x32xf32>
    %c0_i32_92 = arith.constant 0 : i32
    %c0_i32_93 = arith.constant 0 : i32
    %184 = tpu.memref_slice %arg10[%c0_i32_38, %c0_i32_92, %c0_i32_93] : memref<1x4x32xf32, #tpu.memory_space<vmem>> -> memref<1x4x32xf32, #tpu.memory_space<vmem>>
    %185 = tpu.memref_squeeze %184 : memref<1x4x32xf32, #tpu.memory_space<vmem>> -> memref<4x32xf32, #tpu.memory_space<vmem>>
    %186 = arith.index_cast %c3_i32_81 : i32 to index
    %c0_94 = arith.constant 0 : index
    %187 = vector.load %185[%186, %c0_94] : memref<4x32xf32, #tpu.memory_space<vmem>>, vector<1x32xf32>
    tpu.vector_store %185[%186, %c0_94], %183 {strides = array<i32>} : memref<4x32xf32, #tpu.memory_space<vmem>>, vector<1x32xf32>,
    %c4_i32_95 = arith.constant 4 : i32
    %c0_i32_96 = arith.constant 0 : i32
    %c0_i32_97 = arith.constant 0 : i32
    %c0_i32_98 = arith.constant 0 : i32
    %188 = tpu.memref_slice %arg8[%c0_i32_96, %c0_i32_97, %c0_i32_98] : memref<1x12x32xf32, #tpu.memory_space<vmem>> -> memref<1x12x32xf32, #tpu.memory_space<vmem>>
    %189 = tpu.memref_squeeze %188 : memref<1x12x32xf32, #tpu.memory_space<vmem>> -> memref<12x32xf32, #tpu.memory_space<vmem>>
    %c0_99 = arith.constant 0 : index
    %c0_100 = arith.constant 0 : index
    %190 = vector.load %189[%c0_99, %c0_100] : memref<12x32xf32, #tpu.memory_space<vmem>>, vector<8x32xf32>
    %c0_101 = arith.constant 0 : index
    %c0_102 = arith.constant 0 : index
    %191 = vector.load %arg6[%c0_101, %c0_102] : memref<100x32xf32, #tpu.memory_space<vmem>>, vector<8x32xf32>
    %192 = arith.addf %190, %191 : vector<8x32xf32>
    %c0_i32_103 = arith.constant 0 : i32
    %c0_i32_104 = arith.constant 0 : i32
    %c0_i32_105 = arith.constant 0 : i32
    %193 = tpu.memref_slice %arg7[%c0_i32_103, %c0_i32_104, %c0_i32_105] : memref<1x12x32xf32, #tpu.memory_space<vmem>> -> memref<1x12x32xf32, #tpu.memory_space<vmem>>
    %194 = tpu.memref_squeeze %193 : memref<1x12x32xf32, #tpu.memory_space<vmem>> -> memref<12x32xf32, #tpu.memory_space<vmem>>
    %c0_106 = arith.constant 0 : index
    %c0_107 = arith.constant 0 : index
    %195 = vector.load %194[%c0_106, %c0_107] : memref<12x32xf32, #tpu.memory_space<vmem>>, vector<8x32xf32>
    tpu.vector_store %194[%c0_106, %c0_107], %192 {strides = array<i32>} : memref<12x32xf32, #tpu.memory_space<vmem>>, vector<8x32xf32>,
    %c0_i32_108 = arith.constant 0 : i32
    %c0_i32_109 = arith.constant 0 : i32
    %c0_i32_110 = arith.constant 0 : i32
    %196 = tpu.memref_slice %arg8[%c0_i32_108, %c0_i32_109, %c0_i32_110] : memref<1x12x32xf32, #tpu.memory_space<vmem>> -> memref<1x12x32xf32, #tpu.memory_space<vmem>>
    %197 = tpu.memref_squeeze %196 : memref<1x12x32xf32, #tpu.memory_space<vmem>> -> memref<12x32xf32, #tpu.memory_space<vmem>>
    %c8 = arith.constant 8 : index
    %c0_111 = arith.constant 0 : index
    %198 = vector.load %197[%c8, %c0_111] : memref<12x32xf32, #tpu.memory_space<vmem>>, vector<4x32xf32>
    %c0_112 = arith.constant 0 : index
    %c0_113 = arith.constant 0 : index
    %c0_114 = arith.constant 0 : index
    %199 = vector.load %arg9[%c0_112, %c0_113, %c0_114] : memref<1x4x32xf32, #tpu.memory_space<vmem>>, vector<1x4x32xf32>
    %200 = vector.shape_cast %199 : vector<1x4x32xf32> to vector<4x32xf32>
    %201 = arith.addf %198, %200 : vector<4x32xf32>
    %c0_115 = arith.constant 0 : index
    %c0_116 = arith.constant 0 : index
    %c0_117 = arith.constant 0 : index
    %202 = vector.load %arg10[%c0_115, %c0_116, %c0_117] : memref<1x4x32xf32, #tpu.memory_space<vmem>>, vector<1x4x32xf32>
    %203 = vector.shape_cast %202 : vector<1x4x32xf32> to vector<4x32xf32>
    %204 = arith.addf %201, %203 : vector<4x32xf32>
    %c0_i32_118 = arith.constant 0 : i32
    %c0_i32_119 = arith.constant 0 : i32
    %c0_i32_120 = arith.constant 0 : i32
    %205 = tpu.memref_slice %arg7[%c0_i32_118, %c0_i32_119, %c0_i32_120] : memref<1x12x32xf32, #tpu.memory_space<vmem>> -> memref<1x12x32xf32, #tpu.memory_space<vmem>>
    %206 = tpu.memref_squeeze %205 : memref<1x12x32xf32, #tpu.memory_space<vmem>> -> memref<12x32xf32, #tpu.memory_space<vmem>>
    %c8_121 = arith.constant 8 : index
    %c0_122 = arith.constant 0 : index
    %207 = vector.load %206[%c8_121, %c0_122] : memref<12x32xf32, #tpu.memory_space<vmem>>, vector<4x32xf32>
    tpu.vector_store %206[%c8_121, %c0_122], %204 {strides = array<i32>} : memref<12x32xf32, #tpu.memory_space<vmem>>, vector<4x32xf32>,
    return
  }
  func.func @transform_0(%arg0: i32, %arg1: memref<16xi32, #tpu.memory_space<smem>>, %arg2: memref<8xi32, #tpu.memory_space<smem>>, %arg3: memref<8xi32, #tpu.memory_space<smem>>, %arg4: memref<8xi32, #tpu.memory_space<smem>>) -> (i32, i32) {
    %c0_i32 = arith.constant 0 : i32
    %c0_i32_0 = arith.constant 0 : i32
    %c0_i32_1 = arith.constant 0 : i32
    return %c0_i32, %c0_i32_0 : i32, i32
  }
  func.func @transform_1(%arg0: i32, %arg1: memref<16xi32, #tpu.memory_space<smem>>, %arg2: memref<8xi32, #tpu.memory_space<smem>>, %arg3: memref<8xi32, #tpu.memory_space<smem>>, %arg4: memref<8xi32, #tpu.memory_space<smem>>) -> (i32, i32) {
    %c0_i32 = arith.constant 0 : i32
    %c0_i32_0 = arith.constant 0 : i32
    %c0_i32_1 = arith.constant 0 : i32
    return %c0_i32, %c0_i32_0 : i32, i32
  }
  func.func @transform_2(%arg0: i32, %arg1: memref<16xi32, #tpu.memory_space<smem>>, %arg2: memref<8xi32, #tpu.memory_space<smem>>, %arg3: memref<8xi32, #tpu.memory_space<smem>>, %arg4: memref<8xi32, #tpu.memory_space<smem>>) -> (i32, i32, i32) {
    %c0_i32 = arith.constant 0 : i32
    %c0_i32_0 = arith.constant 0 : i32
    %c0_i32_1 = arith.constant 0 : i32
    return %arg0, %c0_i32, %c0_i32_0 : i32, i32, i32
  }
}

</mosaic_0001>

<bundles_post_ra>
// kernel: tpu_custom_call.1
= control target key start
LH: loop header
LB: loop body
LE: loop exit
PB: predicated region body
PF: predicated region fallthrough
CT: control target
= control target key end

     0   :  { %s582_s0 = inlined_call_operand.vmem [shape: s32[16], index: 0, kind: input, shape index: {}]   ;;  %s583_s4 = inlined_call_operand.vmem [shape: f32[11,32], index: 4, kind: input, shape index: {}]   ;;  %s584_s5 = inlined_call_operand.vmem [shape: f32[100,32], index: 5, kind: input, shape index: {}]   ;;  %s585_s6 = inlined_call_operand.vmem [shape: f32[2,12,32], index: 6, kind: output, shape index: {}]   ;;  %s586_s1 = inlined_call_operand.vmem [shape: s32[8], index: 1, kind: input, shape index: {}]   ;;  %s587_s2 = inlined_call_operand.vmem [shape: s32[8], index: 2, kind: input, shape index: {}]   ;;  %s588_s3 = inlined_call_operand.vmem [shape: s32[8], index: 3, kind: input, shape index: {}]  }
   0x1   :  { %s11_s23 = sshll.u32 %s582_s0, 4  ;;  %s15_s26 = sshll.u32 %s586_s1, 4  ;;  %s12_s23 = int_to_ptr.vmem [resolvable:$true] %s11_s23  ;;  %s16_s26 = int_to_ptr.vmem [resolvable:$true] %s15_s26 }
   0x2   :  { %s337_s27 = scalar_lea.vmem %s12_s23, 16  ;;  %p342_p1 = scmp.lt.s32.totalorder %s12_s23, %s12_s23 }
   0x3   :  { %p338_p0 = scmp.ne.s32.totalorder %s12_s23, %s337_s27  ;;  %p343_p2 = scmp.lt.s32.totalorder %s337_s27, %s337_s27 }
   0x5   :  { %p344_p3 = por %p343_p2, %p342_p1 }
   0x7   :  { %p345_p4 = pnand %p344_p3, %p338_p0 }
   0x9   :  { %348 = shalt.err (!%p345_p4)  }
   0xa   :  { %s395_s28 = smov [#allocation6]   ;;  %s349_s29 = scalar_lea.vmem %s16_s26, 16 }
   0xb   :  { %14 = dma.vmem_to_smem %s12_s23, 16, %s395_s28, [#allocation5] }
   0xc   :  { %p350_p5 = scmp.ne.s32.totalorder %s16_s26, %s349_s29  ;;  %p354_p6 = scmp.lt.s32.totalorder %s16_s26, %s16_s26 }
   0xd   :  { %p355_p7 = scmp.lt.s32.totalorder %s349_s29, %s349_s29 }
   0xf   :  { %p356_p8 = por %p355_p7, %p354_p6 }
  0x11   :  { %p357_p9 = pnand %p356_p8, %p350_p5 }
  0x13   :  { %360 = shalt.err (!%p357_p9)  }
  0x14   :  { %s396_s0 = smov [#allocation7]   ;;  %s19_s7 = sshll.u32 %s587_s2, 4  ;;  %s20_s7 = int_to_ptr.vmem [resolvable:$true] %s19_s7 }
  0x15   :  { %18 = dma.vmem_to_smem %s16_s26, 16, %s396_s0, [#allocation5] }
  0x16   :  { %s23_s10 = sshll.u32 %s588_s3, 4  ;;  %s361_s11 = scalar_lea.vmem %s20_s7, 16  ;;  %s24_s10 = int_to_ptr.vmem [resolvable:$true] %s23_s10 }
  0x17   :  { %p362_p10 = scmp.ne.s32.totalorder %s20_s7, %s361_s11  ;;  %p366_p11 = scmp.lt.s32.totalorder %s20_s7, %s20_s7 }
  0x18   :  { %p367_p12 = scmp.lt.s32.totalorder %s361_s11, %s361_s11 }
  0x1a   :  { %p368_p13 = por %p367_p12, %p366_p11 }
  0x1c   :  { %p369_p0 = pnand %p368_p13, %p362_p10 }
  0x1e   :  { %372 = shalt.err (!%p369_p0)  }
  0x1f   :  { %s397_s12 = smov [#allocation8]   ;;  %s373_s13 = scalar_lea.vmem %s24_s10, 16 }
  0x20   :  { %22 = dma.vmem_to_smem %s20_s7, 16, %s397_s12, [#allocation5] }
  0x21   :  { %p374_p1 = scmp.ne.s32.totalorder %s24_s10, %s373_s13  ;;  %p378_p2 = scmp.lt.s32.totalorder %s24_s10, %s24_s10 }
  0x22   :  { %p379_p3 = scmp.lt.s32.totalorder %s373_s13, %s373_s13 }
  0x24   :  { %p380_p4 = por %p379_p3, %p378_p2 }
  0x26   :  { %p381_p5 = pnand %p380_p4, %p374_p1 }
  0x28   :  { %384 = shalt.err (!%p381_p5)  }
  0x29   :  { %s398_s2 = smov [#allocation9]  }
  0x2a   :  { %26 = dma.vmem_to_smem %s24_s10, 16, %s398_s2, [#allocation5] }
  0x2b   :  { %389 = dma.done.wait [#allocation5], 64 }
  0x2c   :  { %390 = vsyncadd [#allocation5], 4294967232 }
  0x2d   :  { %28 = sfence }
  0x2e   :  { %s446_s3 = smov 0  }
  0x2f LB: > { %590 = sst [smem:[#allocation11_spill]] %s393_s3  ;;  %s452_s14 = sadd.s32 4294967295, %s393_s3   ;;  %s393_s3 = sphi %s446_s3, %s34_s3  }
  0x30   : > { %p317_p6 = scmp.ge.s32.totalorder %s393_s3, 1  ;;  %p124_p7 = scmp.lt.s32.totalorder %s393_s3, 3 }
  0x32   : > { %p125_p8 = pnand %p317_p6, %p124_p7 }
  0x33   : > { %s457_s15 = sshll.u32 (!%p125_p8), %s452_s14, 2  ;;  %s460_s16 = sshll.u32 (!%p125_p8), %s452_s14, 3  ;;  %vm150_vm0 = vcmask (!%p125_p8), 253952   ;;  %v240_v22 = vld [vmem:[%s584_s5] sm:$0xff] (!%p125_p8)  ;;  %vm242_vm1 = vcmask (!%p125_p8), 261120   ;;  %vm249_vm2 = vcmask (!%p125_p8), 257024  }
  0x34   : > { %128 = sbr.rel (%p125_p8) target bundleno = 93 (0x5d), region = 28  ;;  %s188_s17 = sld [smem:[#allocation7 + %s457_s15]] (!%p125_p8) }
  0x35   : > { %s189_s18 = sld [smem:[#allocation8 + %s457_s15]] (!%p125_p8)  ;;  %s465_s19 = sadd.s32 (!%p125_p8), 1, %s457_s15 }
  0x36   : > { %s468_s20 = sadd.s32 (!%p125_p8), 2, %s457_s15  ;;  %s201_s21 = sld [smem:[#allocation7 + %s465_s19]] (!%p125_p8) }
  0x37   : > { %s202_s22 = sld [smem:[#allocation8 + %s465_s19]] (!%p125_p8)  ;;  %s475_s25 = sadd.s32 (!%p125_p8), 3, %s457_s15 }
  0x38   : > { %s214_s23 = sld [smem:[#allocation7 + %s468_s20]] (!%p125_p8)  ;;  %s152_s9 = sadd.s32 (!%p125_p8), 1, %s460_s16 }
  0x39   : > { %s215_s24 = sld [smem:[#allocation8 + %s468_s20]] (!%p125_p8)  ;;  %s157_s10 = sadd.s32 (!%p125_p8), 2, %s460_s16 }
  0x3a   : > { %s147_s26 = sld [smem:[#allocation6 + %s460_s16]] (!%p125_p8)  ;;  %s191_s1 = scalar_lea.vmem (!%p125_p8), %s583_s4, %s188_s17 }
  0x3b   : > { %s227_s27 = sld [smem:[#allocation7 + %s475_s25]]  ;;  %s194_s8 = scalar_lea.vmem %s584_s5, %s189_s18  ;;  %v192_v0 = vld [vmem:[%s191_s1] sm:$0x1] }
  0x3c   : > { %s228_s28 = sld [smem:[#allocation8 + %s475_s25]]  ;;  %v195_v1 = vld [vmem:[%s194_s8] sm:$0x1]  ;;  %193 = vst.msk [vmem:[#allocation2 + $0x8] sm:$0x1] %vm150_vm0, %v192_v0  ;;  %s204_s13 = scalar_lea.vmem %s583_s4, %s201_s21 }
  0x3d   : > { %196 = vst.msk [vmem:[#allocation3] sm:$0x1] %vm150_vm0, %v195_v1  ;;  %s207_s17 = scalar_lea.vmem %s584_s5, %s202_s22  ;;  %v205_v2 = vld [vmem:[%s204_s13] sm:$0x1]  ;;  %s153_s8 = sld [smem:[#allocation6 + %s152_s9]] }
  0x3e   : > { %v208_v3 = vld [vmem:[%s207_s17] sm:$0x1]  ;;  %s217_s0 = scalar_lea.vmem %s583_s4, %s214_s23  ;;  %206 = vst.msk [vmem:[#allocation2 + $0x9] sm:$0x1] %vm150_vm0, %v205_v2  ;;  %s162_s9 = sadd.s32 3, %s460_s16 }
  0x3f   : > { %s220_s7 = scalar_lea.vmem %s584_s5, %s215_s24  ;;  %209 = vst.msk [vmem:[#allocation3 + $0x1] sm:$0x1] %vm150_vm0, %v208_v3  ;;  %v218_v4 = vld [vmem:[%s217_s0] sm:$0x1]  ;;  %s163_s17 = sld [smem:[#allocation6 + %s162_s9]] }
  0x40   : > { %v221_v5 = vld [vmem:[%s220_s7] sm:$0x1]  ;;  %s148_s22 = scalar_lea.vmem %s583_s4, %s147_s26  ;;  %219 = vst.msk [vmem:[#allocation2 + $0xa] sm:$0x1] %vm150_vm0, %v218_v4  ;;  %s158_s26 = sld [smem:[#allocation6 + %s157_s10]] }
  0x41   : > { %222 = vst.msk [vmem:[#allocation3 + $0x2] sm:$0x1] %vm150_vm0, %v221_v5  ;;  %s230_s11 = scalar_lea.vmem %s583_s4, %s227_s27  ;;  %v149_v6 = vld [vmem:[%s148_s22] sm:$0x1]  ;;  %s167_s27 = sadd.s32 4, %s460_s16 }
  0x42   : > { %s233_s2 = scalar_lea.vmem %s584_s5, %s228_s28  ;;  %v231_v7 = vld [vmem:[%s230_s11] sm:$0x1]  ;;  %151 = vst.msk [vmem:[#allocation2] sm:$0x1] %vm150_vm0, %v149_v6  ;;  %s168_s29 = sld [smem:[#allocation6 + %s167_s27]] }
  0x43   : > { %v234_v8 = vld [vmem:[%s233_s2] sm:$0x1]  ;;  %232 = vst.msk [vmem:[#allocation2 + $0xb] sm:$0x1] %vm150_vm0, %v231_v7  ;;  %s172_s18 = sadd.s32 5, %s460_s16  ;;  %s177_s28 = sadd.s32 6, %s460_s16 }
  0x44   : > { %235 = vst.msk [vmem:[#allocation3 + $0x3] sm:$0x1] %vm150_vm0, %v234_v8  ;;  %s173_s0 = sld [smem:[#allocation6 + %s172_s18]]  ;;  %s154_s7 = scalar_lea.vmem %s583_s4, %s153_s8 }
  0x45   : > { %s178_s21 = sld [smem:[#allocation6 + %s177_s28]]  ;;  %v155_v9 = vld [vmem:[%s154_s7] sm:$0x1]  ;;  %s182_s10 = sadd.s32 7, %s460_s16 }
  0x46   : > { %s190_s3 = sld [smem:[#allocation9 + %s457_s15]]  ;;  %156 = vst.msk [vmem:[#allocation2 + $0x1] sm:$0x1] %vm150_vm0, %v155_v9  ;;  %s159_s24 = scalar_lea.vmem %s583_s4, %s158_s26 }
  0x47   : > { %s183_s11 = sld [smem:[#allocation6 + %s182_s10]]  ;;  %v160_v10 = vld [vmem:[%s159_s24] sm:$0x1]  ;;  %s164_s2 = scalar_lea.vmem %s583_s4, %s163_s17 }
  0x48   : > { %s203_s9 = sld [smem:[#allocation9 + %s465_s19]]  ;;  %161 = vst.msk [vmem:[#allocation2 + $0x2] sm:$0x1] %vm150_vm0, %v160_v10  ;;  %v165_v11 = vld [vmem:[%s164_s2] sm:$0x1]  ;;  %s169_s15 = scalar_lea.vmem %s583_s4, %s168_s29 }
  0x49   : > { %s216_s16 = sld [smem:[#allocation9 + %s468_s20]]  ;;  %166 = vst.msk [vmem:[#allocation2 + $0x3] sm:$0x1] %vm150_vm0, %v165_v11  ;;  %v170_v12 = vld [vmem:[%s169_s15] sm:$0x1]  ;;  %p141_p9 = scmp.lt.s32.totalorder %s452_s14, 1 }
  0x4a   : > { %s174_s28 = scalar_lea.vmem %s583_s4, %s173_s0  ;;  %s229_s1 = sld [smem:[#allocation9 + %s475_s25]]  ;;  %171 = vst.msk [vmem:[#allocation2 + $0x4] sm:$0x1] %vm150_vm0, %v170_v12  ;;  %v244_v20 = vld [vmem:[#allocation2 + $0x8] sm:$0xf] }
  0x4b   : > { %v175_v13 = vld [vmem:[%s174_s28] sm:$0x1]  ;;  %s179_s30 = scalar_lea.vmem %s583_s4, %s178_s21  ;;  %s593_s14 = smov (!%p141_p9, %s452_s14), 1  ;;  %v245_v21 = vld [vmem:[#allocation3] sm:$0xf] }
  0x4c   : > { %176 = vst.msk [vmem:[#allocation2 + $0x5] sm:$0x1] %vm150_vm0, %v175_v13  ;;  %v180_v14 = vld [vmem:[%s179_s30] sm:$0x1]  ;;  %s197_s7 = scalar_lea.vmem %s584_s5, %s190_s3  ;;  %v246_v24 = vadd.f32 %v245_v21, %v244_v20 }
  0x4d   : > { %181 = vst.msk [vmem:[#allocation2 + $0x6] sm:$0x1] %vm150_vm0, %v180_v14  ;;  %s184_s25 = scalar_lea.vmem %s583_s4, %s183_s11  ;;  %v198_v15 = vld [vmem:[%s197_s7] sm:$0x1] }
  0x4e   : > { %v185_v16 = vld [vmem:[%s184_s25] sm:$0x1]  ;;  %199 = vst.msk [vmem:[#allocation4] sm:$0x1] %vm150_vm0, %v198_v15  ;;  %s210_s23 = scalar_lea.vmem %s584_s5, %s203_s9  ;;  %s324_s9 = sshll.u32 %s593_s14, 4 }
  0x4f   : > { %186 = vst.msk [vmem:[#allocation2 + $0x7] sm:$0x1] %vm150_vm0, %v185_v16  ;;  %v211_v17 = vld [vmem:[%s210_s23] sm:$0x1]  ;;  %s223_s12 = scalar_lea.vmem %s584_s5, %s216_s16  ;;  %s145_s26 = scalar_lea.vmem %s585_s6, %s324_s9 }
  0x50   : > { %212 = vst.msk [vmem:[#allocation4 + $0x1] sm:$0x1] %vm150_vm0, %v211_v17  ;;  %v224_v18 = vld [vmem:[%s223_s12] sm:$0x1]  ;;  %s236_s2 = scalar_lea.vmem %s584_s5, %s229_s1 }
  0x51   : > { %225 = vst.msk [vmem:[#allocation4 + $0x2] sm:$0x1] %vm150_vm0, %v224_v18  ;;  %v237_v19 = vld [vmem:[%s236_s2] sm:$0x1] }
  0x52   : > { %238 = vst.msk [vmem:[#allocation4 + $0x3] sm:$0x1] %vm150_vm0, %v237_v19 }
  0x56   : > { %v239_v23 = vld [vmem:[#allocation2] sm:$0xff] }
  0x57   : > { %v241_v25 = vadd.f32 %v240_v22, %v239_v23 }
  0x59   : > { %243 = vst.msk [vmem:[%s145_s26] sm:$0xff] %vm242_vm1, %v241_v25  ;;  %v247_v26 = vld [vmem:[#allocation4] sm:$0xf] }
  0x5a   : > { %v248_v27 = vadd.f32 %v247_v26, %v246_v24 }
  0x5c   : > { %250 = vst.msk [vmem:[%s145_s26 + $0x8] sm:$0xf] %vm249_vm2, %v248_v27 }
  0x5d PF: > { %s591_s14 = sld [smem:[#allocation11_spill]] }
  0x63   : > { %s34_s3 = sadd.s32 1, %s591_s14  }
  0x64   : > { %p31_p10 = scmp.ge.s32.totalorder %s34_s3, 4  }
  0x66   :  { %33 = sbr.rel (!%p31_p10) target bundleno = 47 (0x2f), region = 75 }

</bundles_post_ra>
